<compile_context>
chip_gen: v7x
topology: tpu7x:2x2x1
jax: 0.10.0
libtpu: 0.0.40
codegen_flags: <defaults>
</compile_context>

<pallas_src>
import functools

import jax
import jax.numpy as jnp
from jax.experimental import pallas as pl
from jax.experimental.pallas import tpu as pltpu


def _dice_sums_kernel(logits_ref, labels_ref, inter_ref, card_ref,
                      inter_acc, card_acc, *, s_total, tile, num_t):
    t = pl.program_id(1)
    c = logits_ref.shape[1]

    # Reset the per-batch accumulators at the first spatial tile.
    @pl.when(t == 0)
    def _init():
        inter_acc[...] = jnp.zeros_like(inter_acc)
        card_acc[...] = jnp.zeros_like(card_acc)

    def accumulate(masked):
        x = logits_ref[0].astype(jnp.float32)               # [C, T]
        labels = labels_ref[0]                               # [1, T] int32
        class_ids = jax.lax.broadcasted_iota(jnp.int32, (c, tile), 0)
        onehot_b = labels == class_ids                        # [C, T] bool

        if masked:
            # Ragged edge tile: clamp out-of-bounds garbage before exp so
            # softmax never sees inf/NaN, and zero the one-hot there too.
            col = jax.lax.broadcasted_iota(jnp.int32, (1, tile), 1) + t * tile
            valid = col < s_total                             # [1, T] bool
            x = jnp.where(valid, x, 0.0)
            onehot_b = jnp.logical_and(onehot_b, valid)

        # Softmax over the class (sublane) axis.
        m = jnp.max(x, axis=0, keepdims=True)
        e = jnp.exp(x - m)
        denom = jnp.sum(e, axis=0, keepdims=True)
        probas = e * pl.reciprocal(denom, approx=False)       # EUP, not VPU div
        if masked:
            probas = jnp.where(valid, probas, 0.0)
        onehot = onehot_b.astype(jnp.float32)

        # Per-lane partial sums: elementwise VPU adds only, no XLU reduction.
        inter_acc[...] += probas * onehot
        card_acc[...] += probas + onehot

    if (s_total % tile) == 0:
        # No ragged edge: mask-free path on every step.
        accumulate(masked=False)
    else:
        is_edge = t == num_t - 1

        @pl.when(jnp.logical_not(is_edge))
        def _interior():
            accumulate(masked=False)

        @pl.when(is_edge)
        def _edge():
            accumulate(masked=True)

    # Single lane reduction + output store per batch (epilogue).
    @pl.when(t == num_t - 1)
    def _finalize():
        inter_ref[0, 0, :] = jnp.sum(inter_acc[...], axis=1)
        card_ref[0, 0, :] = jnp.sum(card_acc[...], axis=1)


def dice_loss_pallas(logits, true, eps=1e-7):
    """logits: [B, C, H, W] float; true: [B, 1, H, W] int labels in [0, C)."""
    B, C, H, W = logits.shape
    if C == 1:
        # TODO(synk): the num_classes == 1 sigmoid/two-channel branch of the
        # PyTorch module is not implemented; multi-class softmax branch only.
        raise NotImplementedError("num_classes == 1 branch not implemented")

    S = H * W
    LANE = 128

    logits_f = logits.reshape(B, C, S)
    labels = true.reshape(B, 1, S).astype(jnp.int32)

    # Pick the largest spatial tile that fits a conservative VMEM budget:
    #   double-buffered inputs 2*(C+1)*tile*4 B + two (C, tile) f32 scratch
    #   accumulators  ->  ~(4*C + 2)*tile*4 B total.
    # Budget ~12 MiB so it is safe on v7x's smaller VMEM as well.
    if S <= LANE:
        tile = S                                   # single full-extent block
    else:
        budget = 12 * 1024 * 1024
        tile_max = budget // ((4 * C + 2) * 4)
        tile_max = max(LANE, (tile_max // LANE) * LANE)
        tile_max = min(tile_max, 8192)
        tile = min(tile_max, (S // LANE) * LANE)   # multiple of 128, <= S

    num_t = pl.cdiv(S, tile)
    grid = (B, num_t)

    kernel = functools.partial(_dice_sums_kernel,
                               s_total=S, tile=tile, num_t=num_t)

    # Explicit VMEM limit (re-derived from the actual footprint, capped at a
    # level that is safe on every generation incl. v7x's 64 MiB VMEM).
    footprint = (4 * C + 2) * tile * 4 + (1 << 20)
    vmem_limit = int(min(max(2 * footprint, 8 << 20), 32 << 20))

    inter, card = pl.pallas_call(
        kernel,
        out_shape=(
            jax.ShapeDtypeStruct((B, 1, C), jnp.float32),
            jax.ShapeDtypeStruct((B, 1, C), jnp.float32),
        ),
        grid_spec=pltpu.PrefetchScalarGridSpec(
            num_scalar_prefetch=0,
            grid=grid,
            in_specs=[
                pl.BlockSpec((1, C, tile), lambda b, t: (b, 0, t)),
                pl.BlockSpec((1, 1, tile), lambda b, t: (b, 0, t)),
            ],
            out_specs=[
                pl.BlockSpec((1, 1, C), lambda b, t: (b, 0, 0)),
                pl.BlockSpec((1, 1, C), lambda b, t: (b, 0, 0)),
            ],
            scratch_shapes=[
                pltpu.VMEM((C, tile), jnp.float32),
                pltpu.VMEM((C, tile), jnp.float32),
            ],
        ),
        compiler_params=pltpu.CompilerParams(
            dimension_semantics=("parallel", "arbitrary"),
            vmem_limit_bytes=vmem_limit),
    )(logits_f, labels)

    # Finalize in plain JAX: sum per-batch partials, dice, 1 - mean.
    inter = jnp.sum(inter[:, 0, :], axis=0)    # [C]
    card = jnp.sum(card[:, 0, :], axis=0)      # [C]
    dice = jnp.mean(2.0 * inter / (card + eps))
    return (1.0 - dice).astype(jnp.float32)


def dice_loss_reference(logits, true, eps=1e-7):
    """Pure-JAX reference mirroring the PyTorch module (multi-class branch)."""
    num_classes = logits.shape[1]
    true_1_hot = jax.nn.one_hot(true[:, 0], num_classes, dtype=jnp.float32)
    true_1_hot = jnp.transpose(true_1_hot, (0, 3, 1, 2))
    probas = jax.nn.softmax(logits.astype(jnp.float32), axis=1)
    dims = (0, 2, 3)
    intersection = jnp.sum(probas * true_1_hot, dims)
    cardinality = jnp.sum(probas + true_1_hot, dims)
    dice = jnp.mean(2.0 * intersection / (cardinality + eps))
    return 1.0 - dice


if __name__ == "__main__":
    key = jax.random.PRNGKey(0)
    k1, k2 = jax.random.split(key)

    B, C, H, W = 2, 4, 16, 16
    logits = jax.random.normal(k1, (B, C, H, W), dtype=jnp.float32)
    true = jax.random.randint(k2, (B, 1, H, W), 0, C, dtype=jnp.int32)

    loss = dice_loss_pallas(logits, true)
    loss = jax.block_until_ready(loss)

    ref = dice_loss_reference(logits, true)
    assert jnp.allclose(loss, ref, atol=1e-5, rtol=1e-5), (loss, ref)

    print("KERNEL_OK")
</pallas_src>

<mosaic_0001>
module attributes {stable_mosaic.version = 11 : i64} {
  func.func @_dice_sums_kernel(%arg0: i32, %arg1: i32, %arg2: memref<1x4x256xf32, #tpu.memory_space<vmem>>, %arg3: memref<1x1x256xi32, #tpu.memory_space<vmem>>, %arg4: memref<1x1x4xf32, #tpu.memory_space<vmem>>, %arg5: memref<1x1x4xf32, #tpu.memory_space<vmem>>, %arg6: memref<4x256xf32, #tpu.memory_space<vmem>>, %arg7: memref<4x256xf32, #tpu.memory_space<vmem>>) attributes {dimension_semantics = [#tpu.dimension_semantics<parallel>, #tpu.dimension_semantics<arbitrary>], iteration_bounds = array<i64: 2, 1>, scalar_prefetch = 0 : i64, scratch_operands = 2 : i64, tpu.core_type = #tpu.core_type<tc>, window_params = [{transform_indices = @transform_0, window_bounds = array<i64: 1, 4, 256>}, {transform_indices = @transform_1, window_bounds = array<i64: 1, 1, 256>}, {transform_indices = @transform_2, window_bounds = array<i64: 1, 1, 4>}, {transform_indices = @transform_3, window_bounds = array<i64: 1, 1, 4>}]} {
    %c0_i32 = arith.constant 0 : i32
    %0 = arith.cmpi eq, %arg1, %c0_i32 : i32
    %1 = arith.extui %0 : i1 to i32
    %c0_i32_0 = arith.constant 0 : i32
    %2 = arith.cmpi ne, %1, %c0_i32_0 : i32
    scf.if %2 {
      %cst_17 = arith.constant 0.000000e+00 : f32
      %33 = vector.broadcast %cst_17 : f32 to vector<4x256xf32>
      %c0_18 = arith.constant 0 : index
      %c0_19 = arith.constant 0 : index
      %34 = vector.load %arg6[%c0_18, %c0_19] : memref<4x256xf32, #tpu.memory_space<vmem>>, vector<4x256xf32>
      tpu.vector_store %arg6[%c0_18, %c0_19], %33 {strides = array<i32>} : memref<4x256xf32, #tpu.memory_space<vmem>>, vector<4x256xf32>,
      %cst_20 = arith.constant 0.000000e+00 : f32
      %35 = vector.broadcast %cst_20 : f32 to vector<4x256xf32>
      %c0_21 = arith.constant 0 : index
      %c0_22 = arith.constant 0 : index
      %36 = vector.load %arg7[%c0_21, %c0_22] : memref<4x256xf32, #tpu.memory_space<vmem>>, vector<4x256xf32>
      tpu.vector_store %arg7[%c0_21, %c0_22], %35 {strides = array<i32>} : memref<4x256xf32, #tpu.memory_space<vmem>>, vector<4x256xf32>,
    } else {
    }
    %c0 = arith.constant 0 : index
    %c0_1 = arith.constant 0 : index
    %c0_2 = arith.constant 0 : index
    %3 = vector.load %arg2[%c0, %c0_1, %c0_2] : memref<1x4x256xf32, #tpu.memory_space<vmem>>, vector<1x4x256xf32>
    %4 = vector.shape_cast %3 : vector<1x4x256xf32> to vector<4x256xf32>
    %c0_3 = arith.constant 0 : index
    %c0_4 = arith.constant 0 : index
    %c0_5 = arith.constant 0 : index
    %5 = vector.load %arg3[%c0_3, %c0_4, %c0_5] : memref<1x1x256xi32, #tpu.memory_space<vmem>>, vector<1x1x256xi32>
    %6 = vector.shape_cast %5 : vector<1x1x256xi32> to vector<1x256xi32>
    %7 = tpu.iota {dimensions = array<i32: 0>} : vector<4x256xi32>
    %8 = vector.broadcast %6 : vector<1x256xi32> to vector<4x256xi32>
    %9 = arith.cmpi eq, %8, %7 : vector<4x256xi32>
    %cst = arith.constant dense<0xFF800000> : vector<256xf32>
    %10 = vector.multi_reduction <maximumf>, %4, %cst [0] : vector<4x256xf32> to vector<256xf32>
    %11 = vector.shape_cast %10 : vector<256xf32> to vector<1x256xf32>
    %12 = vector.broadcast %11 : vector<1x256xf32> to vector<4x256xf32>
    %13 = arith.subf %4, %12 : vector<4x256xf32>
    %14 = math.exp %13 : vector<4x256xf32>
    %cst_6 = arith.constant dense<0.000000e+00> : vector<256xf32>
    %15 = vector.multi_reduction <add>, %14, %cst_6 [0] : vector<4x256xf32> to vector<256xf32>
    %16 = vector.shape_cast %15 : vector<256xf32> to vector<1x256xf32>
    %17 = tpu.reciprocal %16 : vector<1x256xf32> -> vector<1x256xf32>
    %18 = vector.broadcast %17 : vector<1x256xf32> to vector<4x256xf32>
    %19 = arith.mulf %14, %18 : vector<4x256xf32>
    %20 = arith.extui %9 : vector<4x256xi1> to vector<4x256xi32>
    %21 = arith.sitofp %20 : vector<4x256xi32> to vector<4x256xf32>
    %c0_7 = arith.constant 0 : index
    %c0_8 = arith.constant 0 : index
    %22 = vector.load %arg6[%c0_7, %c0_8] : memref<4x256xf32, #tpu.memory_space<vmem>>, vector<4x256xf32>
    %23 = arith.mulf %19, %21 : vector<4x256xf32>
    %24 = arith.addf %22, %23 : vector<4x256xf32>
    %c0_9 = arith.constant 0 : index
    %c0_10 = arith.constant 0 : index
    %25 = vector.load %arg6[%c0_9, %c0_10] : memref<4x256xf32, #tpu.memory_space<vmem>>, vector<4x256xf32>
    tpu.vector_store %arg6[%c0_9, %c0_10], %24 {strides = array<i32>} : memref<4x256xf32, #tpu.memory_space<vmem>>, vector<4x256xf32>,
    %c0_11 = arith.constant 0 : index
    %c0_12 = arith.constant 0 : index
    %26 = vector.load %arg7[%c0_11, %c0_12] : memref<4x256xf32, #tpu.memory_space<vmem>>, vector<4x256xf32>
    %27 = arith.addf %19, %21 : vector<4x256xf32>
    %28 = arith.addf %26, %27 : vector<4x256xf32>
    %c0_13 = arith.constant 0 : index
    %c0_14 = arith.constant 0 : index
    %29 = vector.load %arg7[%c0_13, %c0_14] : memref<4x256xf32, #tpu.memory_space<vmem>>, vector<4x256xf32>
    tpu.vector_store %arg7[%c0_13, %c0_14], %28 {strides = array<i32>} : memref<4x256xf32, #tpu.memory_space<vmem>>, vector<4x256xf32>,
    %c0_i32_15 = arith.constant 0 : i32
    %30 = arith.cmpi eq, %arg1, %c0_i32_15 : i32
    %31 = arith.extui %30 : i1 to i32
    %c0_i32_16 = arith.constant 0 : i32
    %32 = arith.cmpi ne, %31, %c0_i32_16 : i32
    scf.if %32 {
      %c0_17 = arith.constant 0 : index
      %c0_18 = arith.constant 0 : index
      %33 = vector.load %arg6[%c0_17, %c0_18] : memref<4x256xf32, #tpu.memory_space<vmem>>, vector<4x256xf32>
      %cst_19 = arith.constant dense<0.000000e+00> : vector<4xf32>
      %34 = vector.multi_reduction <add>, %33, %cst_19 [1] : vector<4x256xf32> to vector<4xf32>
      %c0_20 = arith.constant 0 : index
      %c0_21 = arith.constant 0 : index
      %c0_22 = arith.constant 0 : index
      %35 = vector.load %arg4[%c0_20, %c0_21, %c0_22] : memref<1x1x4xf32, #tpu.memory_space<vmem>>, vector<1x1x4xf32>
      %36 = vector.shape_cast %35 : vector<1x1x4xf32> to vector<4xf32>
      %37 = vector.shape_cast %34 : vector<4xf32> to vector<1x1x4xf32>
      tpu.vector_store %arg4[%c0_20, %c0_21, %c0_22], %37 {strides = array<i32>} : memref<1x1x4xf32, #tpu.memory_space<vmem>>, vector<1x1x4xf32>,
      %c0_23 = arith.constant 0 : index
      %c0_24 = arith.constant 0 : index
      %38 = vector.load %arg7[%c0_23, %c0_24] : memref<4x256xf32, #tpu.memory_space<vmem>>, vector<4x256xf32>
      %cst_25 = arith.constant dense<0.000000e+00> : vector<4xf32>
      %39 = vector.multi_reduction <add>, %38, %cst_25 [1] : vector<4x256xf32> to vector<4xf32>
      %c0_26 = arith.constant 0 : index
      %c0_27 = arith.constant 0 : index
      %c0_28 = arith.constant 0 : index
      %40 = vector.load %arg5[%c0_26, %c0_27, %c0_28] : memref<1x1x4xf32, #tpu.memory_space<vmem>>, vector<1x1x4xf32>
      %41 = vector.shape_cast %40 : vector<1x1x4xf32> to vector<4xf32>
      %42 = vector.shape_cast %39 : vector<4xf32> to vector<1x1x4xf32>
      tpu.vector_store %arg5[%c0_26, %c0_27, %c0_28], %42 {strides = array<i32>} : memref<1x1x4xf32, #tpu.memory_space<vmem>>, vector<1x1x4xf32>,
    } else {
    }
    return
  }
  func.func @transform_0(%arg0: i32, %arg1: i32) -> (i32, i32, i32) {
    %c0_i32 = arith.constant 0 : i32
    %c0_i32_0 = arith.constant 0 : i32
    return %arg0, %c0_i32, %arg1 : i32, i32, i32
  }
  func.func @transform_1(%arg0: i32, %arg1: i32) -> (i32, i32, i32) {
    %c0_i32 = arith.constant 0 : i32
    %c0_i32_0 = arith.constant 0 : i32
    return %arg0, %c0_i32, %arg1 : i32, i32, i32
  }
  func.func @transform_2(%arg0: i32, %arg1: i32) -> (i32, i32, i32) {
    %c0_i32 = arith.constant 0 : i32
    %c0_i32_0 = arith.constant 0 : i32
    %c0_i32_1 = arith.constant 0 : i32
    return %arg0, %c0_i32, %c0_i32_0 : i32, i32, i32
  }
  func.func @transform_3(%arg0: i32, %arg1: i32) -> (i32, i32, i32) {
    %c0_i32 = arith.constant 0 : i32
    %c0_i32_0 = arith.constant 0 : i32
    %c0_i32_1 = arith.constant 0 : i32
    return %arg0, %c0_i32, %c0_i32_0 : i32, i32, i32
  }
}

</mosaic_0001>

<bundles_post_ra>
// kernel: tpu_custom_call.1
= control target key start
LH: loop header
LB: loop body
LE: loop exit
PB: predicated region body
PF: predicated region fallthrough
CT: control target
= control target key end

     0   :  { %9 = vsyncpa [#allocation5], 0  ;;  %s1120_s0 = inlined_call_operand.hbm [shape: f32[2,4,256], index: 0, kind: input, shape index: {}]   ;;  %s1121_s1 = inlined_call_operand.hbm [shape: s32[2,1,256], index: 1, kind: input, shape index: {}]   ;;  %s1122_s2 = inlined_call_operand.hbm [shape: f32[2,1,4], index: 2, kind: output, shape index: {0}]   ;;  %s1123_s3 = inlined_call_operand.hbm [shape: f32[2,1,4], index: 3, kind: output, shape index: {1}]  }
   0x1   :  { %11 = vsyncpa [#allocation5 + $0x1], 0 }
   0x2   :  { %12 = vsyncpa [#allocation8], 0 }
   0x3   :  { %14 = vsyncpa [#allocation8 + $0x1], 0 }
   0x4   :  { %15 = vsyncpa [#allocation6], 0 }
   0x5   :  { %17 = vsyncpa [#allocation6 + $0x1], 0 }
   0x6   :  { %18 = vsyncpa [#allocation11], 0 }
   0x7   :  { %20 = vsyncpa [#allocation11 + $0x1], 0  ;;  %s846_s12 = smov 0   ;;  %s848_s13 = smov 0  }
   0x8   :  { %s850_s14 = smov 0   ;;  %s852_s15 = smov 0  }
   0x9   :  { %s854_s16 = smov 0   ;;  %s856_s17 = smov 0  }
   0xa LB: > { %s540_s18 = sadd.s32 4294967295, %s819_s17   ;;  %s541_s19 = sadd.s32 4294967294, %s819_s17   ;;  %s819_s17 = sphi %s856_s17, %s26_s17   ;;  %s815_s16 = sphi %s854_s16, %s1143_s16   ;;  %s811_s15 = sphi %s852_s15, %s1142_s15   ;;  %s807_s14 = sphi %s850_s14, %s1141_s14   ;;  %s803_s13 = sphi %s848_s13, %s1140_s13   ;;  %s799_s12 = sphi %s846_s12, %s1139_s12  }
   0xb   : > { %s38_s20 = sadd.s32 1, %s815_s16  ;;  %s47_s21 = sadd.s32 1, %s807_s14 }
   0xc   : > { %p40_p0 = scmp.ge.s32.totalorder %s38_s20, 2  ;;  %p54_p1 = scmp.ne.s32.totalorder %s807_s14, %s803_s13 }
   0xd   : > { %p55_p2 = scmp.eq.s32.totalorder %s819_s17, 0  ;;  %p60_p3 = scmp.ne.s32.totalorder %s803_s13, %s799_s12 }
   0xe   : > { %s1145_s20 = smov (%p40_p0, %s38_s20), 0  ;;  %p61_p5 = scmp.eq.s32.totalorder %s540_s18, 0 }
   0xf   : > { %p887_p4 = por %p55_p2, %p54_p1  ;;  %s42_s23 = ssub.s32 %s815_s16, %s1145_s20 }
  0x10   : > { %p112_p6 = scmp.eq.s32.totalorder %s540_s18, 1  ;;  %p45_p7 = scmp.eq.s32.totalorder %s42_s23, 0 }
  0x11   : > { %p893_p8 = por %p61_p5, %p60_p3  ;;  %p118_p10 = scmp.eq.s32.totalorder %s541_s19, 1 }
  0x12   : > { %p897_p9 = por %p112_p6, %p54_p1  ;;  %p583_p13 = scmp.lt.s32.totalorder %s819_s17, 2 }
  0x13   : > { %s1127_s24 = scalar_select %p893_p8, 1, 0 }
  0x14   : > { %s1128_s25 = scalar_select %p897_p9, 1, 0 }
  0x15   : > { %s902_s26 = scalar_select %p45_p7, %s807_s14, %s47_s21  }
  0x16   : > { %p904_p11 = por %p118_p10, %p60_p3  ;;  %s911_s28 = sand.u32 1, %s807_s14  }
  0x17   : > { %s544_s29 = sshll.u32 %s911_s28, 3  ;;  %s559_s30 = sshll.u32 %s815_s16, 7 }
  0x18   : > { %s1129_s27 = scalar_select %p904_p11, 1, 0 }
  0x19   : > { %s918_s6 = scalar_lea.hbm %s1120_s0, %s559_s30  ;;  %s168_s7 = scalar_lea.vmem [#allocation4], %s544_s29 }
  0x1a   : > { %s178_s8 = sshll.u32 %s168_s7, 4  ;;  %p924_p0 = pnand %p583_p13, %p887_p4  ;;  %s920_s8 = int_to_ptr.vmem [resolvable:$true] %s178_s8 }
  0x1b   : > { %s165_s10 = scalar_lea.sflag [#allocation5], %s911_s28  ;;  %s641_s11 = scalar_lea.hbm %s918_s6, 128 }
  0x1c   : > { %p642_p3 = scmp.ne.s32.totalorder %s918_s6, %s641_s11  ;;  %p643_p5 = pneg %p924_p0 }
  0x1d   : > { %s646_s21 = scalar_lea.hbm %s1120_s0, 256  ;;  %p647_p4 = scmp.lt.u32.totalorder %s918_s6, %s1120_s0 }
  0x1e   : > { %p644_p6 = pnand %p643_p5, %p642_p3  ;;  %p648_p10 = scmp.lt.u32.totalorder %s646_s21, %s641_s11 }
  0x1f   : > { %p650_p12 = scmp.lt.u32.totalorder %s641_s11, %s918_s6 }
  0x20   : > { %p645_p7 = pneg %p644_p6  ;;  %p649_p13 = por %p648_p10, %p647_p4 }
  0x22   : > { %p651_p1 = por %p650_p12, %p649_p13 }
  0x24   : > { %p652_p2 = pnand %p651_p1, %p645_p7 }
  0x26   : > { %655 = shalt.err (!%p652_p2)
}
  0x27   : > { %s656_s29 = scalar_lea.vmem %s920_s8, 128  ;;  %s821_s30 = smov [#allocation4]  }
  0x28   : > { %p657_p3 = scmp.ne.s32.totalorder %s920_s8, %s656_s29  ;;  %s661_s4 = sshll.u32 %s821_s30, 4  ;;  %s662_s4 = int_to_ptr.vmem [resolvable:$false] %s661_s4 }
  0x29   : > { %s663_s5 = scalar_lea.vmem %s662_s4, 256  ;;  %p664_p9 = scmp.lt.s32.totalorder %s920_s8, %s662_s4 }
  0x2a   : > { %p659_p6 = pnand %p657_p3, %p643_p5  ;;  %p665_p4 = scmp.lt.s32.totalorder %s663_s5, %s656_s29 }
  0x2c   : > { %p660_p11 = pneg %p659_p6  ;;  %p666_p10 = por %p665_p4, %p664_p9 }
  0x2e   : > { %p667_p12 = pnand %p666_p10, %p660_p11 }
  0x30   : > { %670 = shalt.err (!%p667_p12)
}
  0x31   : > { %572 = dma.hbm_to_vmem [thread:$0]  (!%p924_p0), %s918_s6, 128, %s920_s8, %s165_s10  }
  0x32   : > { %p1131_p1 = scmp.lt.s32.totalorder %s819_s17, 3  ;;  %p1132_p2 = scmp.ge.s32.totalorder %s819_s17, 1 }
  0x33   : > { %s547_s11 = sshll.u32 %s911_s28, 1  ;;  %s560_s18 = sshll.u32 %s815_s16, 5 }
  0x34   : > { %p960_p7 = pnand %p1132_p2, %p1131_p1  ;;  %s969_s22 = scalar_lea.hbm %s1121_s1, %s560_s18 }
  0x35   : > { %s189_s23 = scalar_lea.vmem [#allocation7], %s547_s11  ;;  %s186_s6 = scalar_lea.sflag [#allocation8], %s911_s28 }
  0x36   : > { %s1133_s7 = scalar_select %p960_p7, 1, 0 }
  0x37   : > { %s199_s29 = sshll.u32 %s189_s23, 4  ;;  %s671_s8 = scalar_lea.hbm %s969_s22, 32  ;;  %s200_s29 = int_to_ptr.vmem [resolvable:$true] %s199_s29 }
  0x38   : > { %p672_p9 = scmp.ne.s32.totalorder %s969_s22, %s671_s8  ;;  %s676_s4 = scalar_lea.hbm %s1121_s1, 64 }
  0x39   : > { %p677_p3 = scmp.lt.u32.totalorder %s969_s22, %s1121_s1  ;;  %p678_p6 = scmp.lt.u32.totalorder %s676_s4, %s671_s8 }
  0x3a   : > { %p674_p11 = pnand %p672_p9, %p643_p5  ;;  %p680_p10 = scmp.lt.u32.totalorder %s671_s8, %s969_s22 }
  0x3b   : > { %p679_p4 = por %p678_p6, %p677_p3 }
  0x3c   : > { %p675_p13 = pneg %p674_p11 }
  0x3d   : > { %p681_p12 = por %p680_p10, %p679_p4 }
  0x3f   : > { %p682_p1 = pnand %p681_p12, %p675_p13 }
  0x41   : > { %685 = shalt.err (!%p682_p1)
}
  0x42   : > { %s686_s28 = scalar_lea.vmem %s200_s29, 32  ;;  %s822_s11 = smov [#allocation7]  }
  0x43   : > { %p687_p2 = scmp.ne.s32.totalorder %s200_s29, %s686_s28  ;;  %s691_s19 = sshll.u32 %s822_s11, 4  ;;  %s692_s19 = int_to_ptr.vmem [resolvable:$false] %s691_s19 }
  0x44   : > { %s693_s21 = scalar_lea.vmem %s692_s19, 64  ;;  %p694_p8 = scmp.lt.s32.totalorder %s200_s29, %s692_s19 }
  0x45   : > { %p689_p9 = pnand %p687_p2, %p643_p5  ;;  %p695_p7 = scmp.lt.s32.totalorder %s693_s21, %s686_s28 }
  0x47   : > { %p690_p11 = pneg %p689_p9  ;;  %p696_p3 = por %p695_p7, %p694_p8 }
  0x49   : > { %p697_p6 = pnand %p696_p3, %p690_p11 }
  0x4b   : > { %700 = shalt.err (!%p697_p6)
}
  0x4c   : > { %575 = dma.hbm_to_vmem [thread:$0]  (!%p924_p0), %s969_s22, 32, %s200_s29, %s186_s6  }
  0x4d   : > { %p1134_p13 = scmp.ne.s32.totalorder %s1133_s7, 0 }
  0x4e   : > { %s994_s23 = sand.u32 (!%p1134_p13), 1, %s803_s13   ;;  %p1135_p5 = scmp.ne.s32.totalorder (!%p1134_p13), %s1127_s24, 0 }
  0x4f   : > { %208 = sbr.rel (%p1134_p13) target bundleno = 342 (0x156), region = 28  ;;  %s551_s8 = sshll.u32 (!%p1134_p13), %s994_s23, 3 }
  0x50   : > { %s211_s10 = scalar_lea.sflag (!%p1134_p13), [#allocation5], %s994_s23  ;;  %s214_s30 = scalar_lea.vmem (!%p1134_p13), [#allocation4], %s551_s8 }
  0x56   : > { %782 = dma.done.wait (%p1135_p5), %s211_s10, 128  }
  0x57   : > { %784 = vsyncadd (%p1135_p5), %s211_s10, 4294967168  ;;  %s552_s9 = sshll.u32 %s994_s23, 1  ;;  %s220_s7 = scalar_lea.sflag [#allocation8], %s994_s23 }
  0x58   : > { %s1004_s22 = scalar_lea.vmem [#allocation7], %s552_s9 }
  0x59   : > { %786 = dma.done.wait (%p1135_p5), %s220_s7, 32  }
  0x5a   : > { %788 = vsyncadd (%p1135_p5), %s220_s7, 4294967264  ;;  %v264_v0 = vlaneseq  ;;  %vm279_vm0 = vcmask 1043456   ;;  %v262_v4 = vld [vmem:[%s214_s30] sm:$0xff]  ;;  %v263_v40 = vld [vmem:[%s1004_s22] sm:$0x3]  ;;  %v823_v45 = vmov 0.0  }
  0x5b   : > { %v277_v5 = vcombine.high %v262_v4, %v262_v4  ;;  %v280_v6 = vsel %vm279_vm0, %v262_v4, -inf  ;;  %s555_s24 = sshll.u32 %s811_s15, 4  ;;  %s247_s29 = scalar_lea.vmem [#allocation9], %s994_s23  ;;  %vm361_vm3 = vcmask 24576  }
  0x5c   : > { %v265_v1 = vshrl.u32 %v264_v0, 7  ;;  %v355_v2 = vand.u32 127, %v264_v0  ;;  %v281_v7 = vrot.slane %v280_v6, 4  ;;  %s396_s6 = sshll.u32 %s247_s29, 4  ;;  %s1029_s18 = scalar_lea.hbm %s1122_s2, %s555_s24  ;;  %s1031_s6 = int_to_ptr.vmem [resolvable:$true] %s396_s6 }
  0x5d   : > { %v287_v8 = vsel %vm279_vm0, %v277_v5, -inf  ;;  %s253_s28 = scalar_lea.vmem [#allocation10], %s994_s23  ;;  %s380_s19 = scalar_lea.sflag [#allocation6], %s994_s23 }
  0x5e   : > { %v1010_v3 = vsub.s32 %v355_v2, %v265_v1  ;;  %v282_v9 = vmax.f32 %v280_v6, %v281_v7  ;;  %v288_v10 = vrot.slane %v287_v8, 4  ;;  %v268_v38 = vsub.s32 0, %v265_v1  ;;  %s1036_s11 = sshll.u32 %s253_s28, 4  ;;  %s701_s21 = scalar_lea.vmem %s1031_s6, 16  ;;  %s1070_s11 = int_to_ptr.vmem [resolvable:$true] %s1036_s11 }
  0x5f   : > { %v272_v39 = vsub.s32 1, %v265_v1  ;;  %p702_p8 = scmp.ne.s32.totalorder %s1031_s6, %s701_s21  ;;  %p1136_p0 = scmp.ne.s32.totalorder %s1128_s25, 0 }
  0x60   : > { %v283_v11 = vrot.slane %v282_v9, 2  ;;  %v289_v12 = vmax.f32 %v287_v8, %v288_v10  ;;  %v269_v42 = vrot.slane %v263_v40, %v268_v38  ;;  %s824_s8 = smov [#allocation9]  }
  0x61   : > { %v273_v43 = vrot.slane %v263_v40, %v272_v39  ;;  %p703_p7 = pnand %p702_p8, %p1136_p0  ;;  %s705_s10 = sshll.u32 %s824_s8, 4  ;;  %s706_s10 = int_to_ptr.vmem [resolvable:$false] %s705_s10 }
  0x62   : > { %v284_v13 = vmax.f32 %v282_v9, %v283_v11  ;;  %v290_v14 = vrot.slane %v289_v12, 2  ;;  %vm274_vm1 = vcmp.eq.s32.totalorder %v269_v42, %v265_v1  ;;  %s707_s30 = scalar_lea.vmem %s706_s10, 32  ;;  %p708_p10 = scmp.lt.s32.totalorder %s1031_s6, %s706_s10 }
  0x63   : > { %vm275_vm2 = vcmp.eq.s32.totalorder %v273_v43, %v265_v1  ;;  %v553_v46 = vsel %vm274_vm1, 1.0, %v823_v45  ;;  %p704_p4 = pneg %p703_p7  ;;  %p709_p12 = scmp.lt.s32.totalorder %s707_s30, %s701_s21 }
  0x64   : > { %v285_v15 = vrot.slane %v284_v13, 1  ;;  %v291_v16 = vmax.f32 %v289_v12, %v290_v14  ;;  %v554_v47 = vsel %vm275_vm2, 1.0, %v823_v45 }
  0x65   : > { %v332_v50 = vcombine.low %v553_v46, %v554_v47  ;;  %p710_p1 = por %p709_p12, %p708_p10 }
  0x66   : > { %v286_v17 = vmax.f32 %v284_v13, %v285_v15  ;;  %v292_v18 = vrot.slane %v291_v16, 1 }
  0x67   : > { %p711_p2 = pnand %p710_p1, %p704_p4 }
  0x68   : > { %v293_v19 = vmax.f32 %v291_v16, %v292_v18 }
  0x6a   : > { %v296_v20 = vcombine.low %v286_v17, %v293_v19 }
  0x6c   : > { %v298_v21 = vsub.f32 %v262_v4, %v296_v20 }
  0x6e   : > { %v299_v22 = vmul.f32 1.442695, %v298_v21 }
  0x70   : > { %635 = vpow2.f32 %v299_v22 }
  0x7a   : > { %v636_v23 = vpop.eup %635 }
  0x7b   : > { %v302_v24 = vcombine.high %v636_v23, %v636_v23  ;;  %v304_v25 = vsel %vm279_vm0, %v636_v23, 0.0 }
  0x7c   : > { %v305_v26 = vrot.slane %v304_v25, 4 }
  0x7d   : > { %v311_v27 = vsel %vm279_vm0, %v302_v24, 0.0 }
  0x7e   : > { %v306_v28 = vadd.f32 %v305_v26, %v304_v25  ;;  %v312_v29 = vrot.slane %v311_v27, 4 }
  0x80   : > { %v307_v30 = vrot.slane %v306_v28, 2  ;;  %v313_v31 = vadd.f32 %v312_v29, %v311_v27 }
  0x82   : > { %v308_v32 = vadd.f32 %v307_v30, %v306_v28  ;;  %v314_v33 = vrot.slane %v313_v31, 2 }
  0x84   : > { %v309_v34 = vrot.slane %v308_v32, 1  ;;  %v315_v35 = vadd.f32 %v314_v33, %v313_v31 }
  0x86   : > { %v310_v36 = vadd.f32 %v309_v34, %v308_v32  ;;  %v316_v37 = vrot.slane %v315_v35, 1 }
  0x88   : > { %v317_v41 = vadd.f32 %v316_v37, %v315_v35  ;;  %637 = vrcp.f32 %v310_v36 }
  0x8a   : > { %639 = vrcp.f32 %v317_v41 }
  0x92   : > { %v638_v44 = vpop.eup %637 }
  0x94   : > { %v640_v48 = vpop.eup %639 }
  0x95   : > { %v322_v49 = vcombine.low %v638_v44, %v640_v48 }
  0x97   : > { %v324_v51 = vmul.f32 %v636_v23, %v322_v49 }
  0x99   : > { %v334_v52 = vmul.f32 %v332_v50, %v324_v51  ;;  %v338_v53 = vadd.f32 %v332_v50, %v324_v51 }
  0x9b   : > { %v346_v54 = vcombine.high %v334_v52, %v334_v52  ;;  %v348_v55 = vsel %vm279_vm0, %v334_v52, 0.0  ;;  %v365_v56 = vcombine.high %v338_v53, %v338_v53  ;;  %v367_v58 = vsel %vm279_vm0, %v338_v53, 0.0 }
  0x9d   : > { %v349_v57 = vsel %vm279_vm0, %v346_v54, 0.0  ;;  %v368_v59 = vsel %vm279_vm0, %v365_v56, 0.0 }
  0x9e   : > { %v350_v60 = vadd.f32 %v349_v57, %v348_v55  ;;  %v369_v61 = vadd.f32 %v368_v59, %v367_v58 }
  0xa0   : > { %351 = vadd.xlane.f32.xlu0 %v350_v60 }
  0xa4   : > { %370 = vadd.xlane.f32.xlu0 %v369_v61 }
 0x12d   : > { %v352_v62 = vpop.xlane.xlu0 %351 }
 0x12e   : > { %v359_v63 = vrot.slane %v352_v62, %v1010_v3 }
 0x130   : > { %362 = vst.msk [vmem:[%s247_s29] sm:$0x1] %vm361_vm3, %v359_v63 }
 0x131   : > { %v371_v0 = vpop.xlane.xlu0 %370 }
 0x132   : > { %714 = shalt.err (!%p711_p2)
}
 0x133   : > { %s715_s9 = scalar_lea.hbm %s1029_s18, 16  ;;  %s719_s29 = scalar_lea.hbm %s1122_s2, 32 }
 0x134   : > { %p716_p9 = scmp.ne.s32.totalorder %s1029_s18, %s715_s9  ;;  %p720_p6 = scmp.lt.u32.totalorder %s1029_s18, %s1122_s2 }
 0x135   : > { %p721_p13 = scmp.lt.u32.totalorder %s719_s29, %s715_s9  ;;  %p723_p8 = scmp.lt.u32.totalorder %s715_s9, %s1029_s18 }
 0x136   : > { %p717_p11 = pnand %p716_p9, %p1136_p0 }
 0x137   : > { %p722_p5 = por %p721_p13, %p720_p6 }
 0x138   : > { %p718_p3 = pneg %p717_p11 }
 0x139   : > { %p724_p7 = por %p723_p8, %p722_p5 }
 0x13b   : > { %p725_p4 = pnand %p724_p7, %p718_p3 }
 0x13d   : > { %728 = shalt.err (!%p725_p4)
}
 0x13e   : > { %565 = dma.vmem_to_hbm [thread:$0]  (%p1136_p0), %s1031_s6, 16, %s1029_s18, %s380_s19   ;;  %v376_v1 = vrot.slane %v371_v0, %v1010_v3 }
 0x13f   : > { %s1067_s10 = scalar_lea.hbm %s1123_s3, %s555_s24  ;;  %s384_s30 = scalar_lea.sflag [#allocation11], %s994_s23 }
 0x140   : > { %378 = vst.msk [vmem:[%s253_s28] sm:$0x1] %vm361_vm3, %v376_v1  ;;  %s729_s9 = scalar_lea.vmem %s1070_s11, 16  ;;  %s825_s15 = smov [#allocation10]  }
 0x141   : > { %p730_p10 = scmp.ne.s32.totalorder %s1070_s11, %s729_s9  ;;  %s733_s6 = sshll.u32 %s825_s15, 4  ;;  %s734_s6 = int_to_ptr.vmem [resolvable:$false] %s733_s6 }
 0x142   : > { %s735_s18 = scalar_lea.vmem %s734_s6, 32  ;;  %p736_p2 = scmp.lt.s32.totalorder %s1070_s11, %s734_s6 }
 0x143   : > { %p731_p12 = pnand %p730_p10, %p1136_p0  ;;  %p737_p9 = scmp.lt.s32.totalorder %s735_s18, %s729_s9 }
 0x145   : > { %p732_p1 = pneg %p731_p12  ;;  %p738_p11 = por %p737_p9, %p736_p2 }
 0x147   : > { %p739_p3 = pnand %p738_p11, %p732_p1 }
 0x149   : > { %742 = shalt.err (!%p739_p3)
}
 0x14a   : > { %s743_s23 = scalar_lea.hbm %s1067_s10, 16  ;;  %s747_s19 = scalar_lea.hbm %s1123_s3, 32 }
 0x14b   : > { %p744_p6 = scmp.ne.s32.totalorder %s1067_s10, %s743_s23  ;;  %p748_p8 = scmp.lt.u32.totalorder %s1067_s10, %s1123_s3 }
 0x14c   : > { %p749_p7 = scmp.lt.u32.totalorder %s747_s19, %s743_s23  ;;  %p751_p10 = scmp.lt.u32.totalorder %s743_s23, %s1067_s10 }
 0x14d   : > { %p745_p13 = pnand %p744_p6, %p1136_p0 }
 0x14e   : > { %p750_p4 = por %p749_p7, %p748_p8 }
 0x14f   : > { %p746_p5 = pneg %p745_p13 }
 0x150   : > { %p752_p12 = por %p751_p10, %p750_p4 }
 0x152   : > { %p753_p1 = pnand %p752_p12, %p746_p5 }
 0x154   : > { %756 = shalt.err (!%p753_p1)
}
 0x155   : > { %566 = dma.vmem_to_hbm [thread:$0]  (%p1136_p0), %s1070_s11, 16, %s1067_s10, %s384_s30  }
 0x156 PF: > { %s421_s29 = sand.u32 1, %s799_s12   ;;  %p1137_p2 = scmp.ne.s32.totalorder %s1129_s27, 0 }
 0x157   : > { %p1138_p9 = scmp.ge.s32.totalorder %s819_s17, 2  ;;  %s422_s4 = scalar_lea.sflag [#allocation6], %s421_s29 }
 0x159   : > { %p577_p11 = pnand %p1138_p9, %p1137_p2 }
 0x15b   : > { %790 = dma.done.wait (!%p577_p11), %s422_s4, 16  }
 0x15c   : > { %792 = vsyncadd (!%p577_p11), %s422_s4, 4294967280  ;;  %s430_s5 = scalar_lea.sflag [#allocation11], %s421_s29 }
 0x15d   : > { %794 = dma.done.wait (!%p577_p11), %s430_s5, 16  }
 0x15e   : > { %796 = vsyncadd (!%p577_p11), %s430_s5, 4294967280  ;;  %s26_s17 = sadd.s32 1, %s819_s17   ;;  %s1139_s12 = smov %s803_s13 }
 0x15f   : > { %p23_p3 = scmp.ge.s32.totalorder %s26_s17, 4   ;;  %s1140_s13 = smov %s807_s14 }
 0x160   : > { %s1141_s14 = smov %s902_s26  ;;  %s1142_s15 = smov %s815_s16 }
 0x161   : > { %s1143_s16 = smov %s1145_s20  ;;  %25 = sbr.rel (!%p23_p3) target bundleno = 10 (0xa), region = 111 }
 0x168   :  { %434 = vsyncpa [#allocation5], 1 }
 0x169   :  { %436 = vsyncpa [#allocation5 + $0x1], 1 }
 0x16a   :  { %437 = vsyncpa [#allocation8], 1 }
 0x16b   :  { %439 = vsyncpa [#allocation8 + $0x1], 1 }
 0x16c   :  { %440 = vsyncpa [#allocation6], 1 }
 0x16d   :  { %442 = vsyncpa [#allocation6 + $0x1], 1 }
 0x16e   :  { %443 = vsyncpa [#allocation11], 1 }
 0x16f   :  { %445 = vsyncpa [#allocation11 + $0x1], 1 }

</bundles_post_ra>
